<compile_context>
chip_gen: v6e
topology: v6e:2x2x1
jax: 0.10.0
libtpu: 0.0.40
codegen_flags: <defaults>
</compile_context>

<pallas_src>
import math

import jax
import jax.numpy as jnp
from jax.experimental import pallas as pl
from jax.experimental.pallas import tpu as pltpu

# ----------------------------- configuration ---------------------------------
N_CLS = 4            # number of classes (2..8 in the real datasets)
CTX_DIM = 128        # CLIP text transformer width (ctx_dim)
N_CTX = 4            # learned context tokens
LLM_DIM = 512        # llm_embed_dim (4096 in the real model; shrunk for the demo)
LOW_RANK = 16        # low_rank_dimension (shared by LoReFT and LoRA, as in the module)
PREFIX_LEN = 2       # cfg.TRAINER.PROMPTSRC.PREFIX_LENGTH
SUFFIX_LEN = 2       # cfg.TRAINER.PROMPTSRC.SUFFIX_LENGTH
TOTAL_LEN = 8        # llm_rep_length (equal for all classes -> equal-length branch)
BATCH = 2            # image batch size
MAX_TOKENS = 77      # CLIP context length

# MXU operand dtype (accumulation is always float32 via preferred_element_type).
MM_DTYPE = jnp.bfloat16


def _round_up(x, m):
    return ((x + m - 1) // m) * m


def _pick_class_tile(n_cls, ctx_dim, max_block_bytes=4 << 20):
    """Largest divisor of n_cls whose (tc, 77, ctx_dim) f32 template block fits
    the VMEM budget.  tc must be 8-aligned unless it covers all classes
    (sublane constraint on the (tc, r) delta block)."""
    for tc in range(n_cls, 0, -1):
        if n_cls % tc:
            continue
        if tc * MAX_TOKENS * ctx_dim * 4 > max_block_bytes:
            continue
        if tc == n_cls or tc % 8 == 0:
            return tc
    return n_cls


# ------------------ Pallas kernel 1: row-tiled LoRA projection ----------------
def _lora_kernel(x_ref, a_ref, b_ref, o_ref):
    """x: (tm, D), a: (D, r), b: (r, ctx) -> o: (tm, ctx), f32 accumulation."""
    h = jnp.dot(x_ref[...], a_ref[...], preferred_element_type=jnp.float32)
    o_ref[...] = jnp.dot(h.astype(MM_DTYPE), b_ref[...],
                         preferred_element_type=jnp.float32)


def lora_proj(x, a_t, b_t, tile_m=512):
    """Row-tiled LoRA projection x @ A^T @ B^T.

    Memory bound: x is streamed as bf16 (halves HBM bytes), rows tiled at 512
    (amortizes per-step overhead), grid uses cdiv so no jnp.pad copy is made.
    """
    n_rows, d = x.shape
    r = a_t.shape[1]
    c_out = b_t.shape[1]
    tm = min(tile_m, _round_up(n_rows, 8))
    return pl.pallas_call(
        _lora_kernel,
        out_shape=jax.ShapeDtypeStruct((n_rows, c_out), jnp.float32),
        grid_spec=pltpu.PrefetchScalarGridSpec(
            num_scalar_prefetch=0,
            grid=(pl.cdiv(n_rows, tm),),
            in_specs=[pl.BlockSpec((tm, d), lambda i: (i, 0)),
                      pl.BlockSpec((d, r), lambda i: (0, 0)),
                      pl.BlockSpec((r, c_out), lambda i: (0, 0))],
            out_specs=pl.BlockSpec((tm, c_out), lambda i: (i, 0)),
        ),
        compiler_params=pltpu.CompilerParams(dimension_semantics=("parallel",)),
    )(x.astype(MM_DTYPE), a_t.astype(MM_DTYPE), b_t.astype(MM_DTYPE))


# ---------- Pallas kernel 2: fused intervention correction + assembly ---------
def assemble_prompts(template, delta, rtab, *, tok_start, suf_start, class_tile):
    """Write the final (bs, n_cls, 77, ctx) prompts directly.

    template : (n_cls, 77, ctx)          f32   batch-invariant prompt template
                                               (token_prefix|ctx|lora(llm)|suffix)
    delta    : (2, bs, P, n_cls, r)      bf16  LoReFT low-rank shift (position-major)
    rtab     : (2, r, ctx)               bf16  R^T @ A^T @ B^T  per intervention type
    out      : (bs, n_cls, 77, ctx)      f32

    out[b, c, :] = template[c, :];  at the prefix / suffix intervened token
    positions the correction delta @ rtab is added on top (LoRA is linear, so
    lora(base + delta@R^T) = lora(base) + delta @ rtab exactly).
    """
    n_cls, n_tok, ctx_dim = template.shape
    T, bs, pre_len, n_cls_d, r = delta.shape
    assert n_cls_d == n_cls and T == 2
    suf_len = pre_len                      # PREFIX_LEN == SUFFIX_LEN (enforced upstream)
    tc = class_tile
    n_tiles = n_cls // tc

    def kernel(tmpl_ref, delta_ref, rtab_ref, out_ref):
        tmpl = tmpl_ref[...]                                     # (tc, 77, ctx) f32
        out_ref[0] = tmpl
        # prefix intervention: token rows tok_start + i
        for i in range(pre_len):
            corr = jnp.dot(delta_ref[0, 0, i], rtab_ref[0],
                           preferred_element_type=jnp.float32)   # (tc, ctx)
            out_ref[0, :, tok_start + i, :] = tmpl[:, tok_start + i, :] + corr
        # suffix intervention: token rows suf_start + j
        for j in range(suf_len):
            corr = jnp.dot(delta_ref[1, 0, j], rtab_ref[1],
                           preferred_element_type=jnp.float32)   # (tc, ctx)
            out_ref[0, :, suf_start + j, :] = tmpl[:, suf_start + j, :] + corr

    return pl.pallas_call(
        kernel,
        out_shape=jax.ShapeDtypeStruct((bs, n_cls, n_tok, ctx_dim), jnp.float32),
        grid_spec=pltpu.PrefetchScalarGridSpec(
            num_scalar_prefetch=0,
            grid=(bs, n_tiles),
            in_specs=[
                pl.BlockSpec((tc, n_tok, ctx_dim), lambda b, c: (c, 0, 0)),
                pl.BlockSpec((T, 1, pre_len, tc, r), lambda b, c: (0, b, 0, c, 0)),
                pl.BlockSpec((T, r, ctx_dim), lambda b, c: (0, 0, 0)),
            ],
            out_specs=pl.BlockSpec((1, tc, n_tok, ctx_dim),
                                   lambda b, c: (b, c, 0, 0)),
        ),
        compiler_params=pltpu.CompilerParams(
            dimension_semantics=("parallel", "parallel")),
    )(template, delta, rtab)


# ------------------------------ model forward ---------------------------------
def vl_prompt_learner_forward(params, img_fea):
    llm_prompt = params["llm_prompt"]              # (n_cls, L, D) f32
    n_cls, L, D = llm_prompt.shape
    n_ctx, ctx_dim = params["ctx"].shape
    P, S = PREFIX_LEN, SUFFIX_LEN
    if P != S:
        # TODO(synk): unequal prefix/suffix lengths need a padded position axis.
        raise NotImplementedError("only PREFIX_LENGTH == SUFFIX_LENGTH is implemented")
    tok_start = 1 + n_ctx
    if tok_start + L > MAX_TOKENS:
        # TODO(synk): truncation of intervened llm tokens past the 77-token limit.
        raise NotImplementedError("llm tokens must fit inside the 77-token context")
    suf_start = tok_start + L - S

    lora_a = params["lora_a_t"]                    # (D, r)
    lora_b = params["lora_b_t"]                    # (r, ctx)

    # (1) Batch-invariant LoRA projection of ALL llm tokens (the only heavy,
    #     llm_dim-wide matmul).  Done once, not per batch element.
    proj_all = lora_proj(llm_prompt.reshape(n_cls * L, D), lora_a, lora_b)
    proj_all = proj_all.reshape(n_cls, L, ctx_dim)

    # (2) Batch-invariant 77-token prompt template:
    #     [token_prefix | ctx | lora(llm tokens) | token_suffix][:77]
    ctx_b = jnp.broadcast_to(params["ctx"][None], (n_cls, n_ctx, ctx_dim))
    template = jnp.concatenate(
        [params["token_prefix"], ctx_b, proj_all, params["token_suffix"]],
        axis=1)[:, :MAX_TOKENS]                    # (n_cls, 77, ctx)

    # (3) Intervention algebra, all r(=16)-wide, hoisted out of the kernel.
    #     base rows are position-major: row = position * n_cls + class.
    pre_base = jnp.swapaxes(llm_prompt[:, :P], 0, 1).reshape(P * n_cls, D)
    suf_base = jnp.swapaxes(llm_prompt[:, L - S:], 0, 1).reshape(S * n_cls, D)
    base2 = jnp.stack([pre_base, suf_base], axis=0)              # (2, M, D)
    ip = {k: jnp.stack([params["prefix_int"][k], params["suffix_int"][k]], axis=0)
          for k in params["prefix_int"]}

    # batch-invariant: base @ (Wls_a - R) + bls      (learned_source a-half minus rotation)
    smr = jnp.einsum("tmd,tdr->tmr", base2, ip["wls_a"] - ip["rot"]) + ip["bls"]
    # batch-dependent but tiny: processed image feature and rd @ Wls_b
    p = jnp.einsum("bc,tcr->tbr", img_fea, ip["w1"]) + ip["b1"]          # (2, bs, r)
    pif = jnp.einsum("tbr,trd->tbd", p, ip["w2"]) + ip["b2"]             # (2, bs, D)
    rdw = jnp.einsum("tbd,tmd,tdj->tbmj", pif, base2, ip["wls_b"])       # (2, bs, M, r)
    # act_fn is 'linear' (identity); Dropout(0.1) is identity in eval mode.
    # TODO(synk): training-time Dropout(0.1) inside learned_source not modelled.
    delta = rdw + smr[:, None]                                           # (2, bs, M, r)
    delta = delta.reshape(2, img_fea.shape[0], P, n_cls, LOW_RANK)

    # R^T @ A^T @ B^T : maps the low-rank shift straight to ctx_dim space.
    rtab = jnp.einsum("tdr,dk,kc->trc", ip["rot"], lora_a, lora_b)       # (2, r, ctx)

    # (4) Fused assembly kernel writes the final prompts layout directly.
    tc = _pick_class_tile(n_cls, ctx_dim)
    return assemble_prompts(template, delta.astype(MM_DTYPE), rtab.astype(MM_DTYPE),
                            tok_start=tok_start, suf_start=suf_start, class_tile=tc)


# ---------------------- pure-JAX float32 reference ----------------------------
def reference_forward(params, img_fea):
    """Direct float32 re-implementation of the PyTorch module (eval mode)."""
    llm_prompt = params["llm_prompt"]
    n_cls, L, D = llm_prompt.shape
    n_ctx, ctx_dim = params["ctx"].shape
    bs = img_fea.shape[0]
    P, S = PREFIX_LEN, SUFFIX_LEN

    def intervene(ipar, rep, img):                     # rep (n_cls, D), img (bs, C)
        pif = (img @ ipar["w1"] + ipar["b1"]) @ ipar["w2"] + ipar["b2"]    # (bs, D)
        rd = pif[:, None, :] * rep[None, :, :]                              # (bs, n_cls, D)
        shifted = (rep @ ipar["wls_a"] + ipar["bls"])[None] + rd @ ipar["wls_b"]
        rotated = rep @ ipar["rot"]                                         # (n_cls, r)
        return rep[None] + (shifted - rotated[None]) @ jnp.swapaxes(ipar["rot"], 0, 1)

    after_pre = jnp.stack([intervene(params["prefix_int"], llm_prompt[:, i], img_fea)
                           for i in range(P)], axis=2)                      # (bs,n_cls,P,D)
    after_suf = jnp.stack([intervene(params["suffix_int"], llm_prompt[:, L - S + j], img_fea)
                           for j in range(S)], axis=2)                      # (bs,n_cls,S,D)
    mid = jnp.broadcast_to(llm_prompt[None, :, P:L - S], (bs, n_cls, L - P - S, D))
    after_int = jnp.concatenate([after_pre, mid, after_suf], axis=2)        # (bs,n_cls,L,D)
    proj = (after_int @ params["lora_a_t"]) @ params["lora_b_t"]            # (bs,n_cls,L,ctx)

    ctx_b = jnp.broadcast_to(params["ctx"][None], (n_cls, n_ctx, ctx_dim))
    parts = [jnp.broadcast_to(params["token_prefix"][None], (bs, n_cls, 1, ctx_dim)),
             jnp.broadcast_to(ctx_b[None], (bs, n_cls, n_ctx, ctx_dim)),
             proj,
             jnp.broadcast_to(params["token_suffix"][None],
                              (bs,) + params["token_suffix"].shape)]
    return jnp.concatenate(parts, axis=2)[:, :, :MAX_TOKENS]


# ------------------------------ parameter init ---------------------------------
def init_intervention_params(key):
    ks = jax.random.split(key, 6)
    orth = jax.nn.initializers.orthogonal()
    return dict(
        rot=orth(ks[0], (LLM_DIM, LOW_RANK), jnp.float32),                 # LowRankRotateLayer
        w1=0.02 * jax.random.normal(ks[1], (CTX_DIM, LOW_RANK), jnp.float32),
        b1=0.01 * jax.random.normal(ks[2], (1, LOW_RANK), jnp.float32),
        w2=0.02 * jax.random.normal(ks[3], (LOW_RANK, LLM_DIM), jnp.float32),
        b2=0.01 * jax.random.normal(ks[4], (1, LLM_DIM), jnp.float32),
        wls_a=0.02 * jax.random.normal(ks[5], (LLM_DIM, LOW_RANK), jnp.float32),
        wls_b=0.02 * jax.random.normal(jax.random.fold_in(key, 7),
                                       (LLM_DIM, LOW_RANK), jnp.float32),
        bls=jnp.zeros((1, LOW_RANK), jnp.float32),
    )


def init_params(key):
    ks = jax.random.split(key, 10)
    # TODO(synk): llm_prompt / token embeddings come from .pth LLM reps + the CLIP
    # tokenizer in the original module; here they are deterministic random
    # placeholders with the same shape roles.
    suffix_tokens = MAX_TOKENS - 1 - N_CTX
    return dict(
        ctx=0.02 * jax.random.normal(ks[0], (N_CTX, CTX_DIM), jnp.float32),
        llm_prompt=0.02 * jax.random.normal(ks[1], (N_CLS, TOTAL_LEN, LLM_DIM), jnp.float32),
        token_prefix=0.02 * jax.random.normal(ks[2], (N_CLS, 1, CTX_DIM), jnp.float32),
        token_suffix=0.02 * jax.random.normal(ks[3], (N_CLS, suffix_tokens, CTX_DIM), jnp.float32),
        prefix_int=init_intervention_params(ks[4]),
        suffix_int=init_intervention_params(ks[5]),
        # LoRA (kaiming_uniform with a=sqrt(5) -> bound = 1/sqrt(fan_in)), stored transposed.
        lora_a_t=jax.random.uniform(ks[6], (LLM_DIM, LOW_RANK), jnp.float32,
                                    -1.0 / math.sqrt(LLM_DIM), 1.0 / math.sqrt(LLM_DIM)),
        lora_b_t=jax.random.uniform(ks[7], (LOW_RANK, CTX_DIM), jnp.float32,
                                    -1.0 / math.sqrt(LOW_RANK), 1.0 / math.sqrt(LOW_RANK)),
    )


# ------------------------------------ main -------------------------------------
if __name__ == "__main__":
    key = jax.random.PRNGKey(0)
    params = init_params(key)
    img_fea = jax.random.normal(jax.random.fold_in(key, 123), (BATCH, CTX_DIM), jnp.float32)

    fwd = jax.jit(vl_prompt_learner_forward)
    prompts = jax.block_until_ready(fwd(params, img_fea))

    assert prompts.shape == (BATCH, N_CLS, MAX_TOKENS, CTX_DIM), prompts.shape
    assert bool(jnp.all(jnp.isfinite(prompts)))

    # Validate against the pure-JAX float32 reference (bf16 MXU operands give
    # ~1e-4 absolute deviation at these scales; tolerance is generous).
    ref = jax.block_until_ready(jax.jit(reference_forward)(params, img_fea))
    max_err = float(jnp.max(jnp.abs(prompts - ref)))
    assert max_err < 1e-2, f"max abs err vs f32 reference: {max_err}"

    print("KERNEL_OK")
</pallas_src>

<mosaic_0001>
module attributes {stable_mosaic.version = 11 : i64} {
  func.func @_lora_kernel(%arg0: i32, %arg1: memref<32x512xbf16, #tpu.memory_space<vmem>>, %arg2: memref<512x16xbf16, #tpu.memory_space<vmem>>, %arg3: memref<16x128xbf16, #tpu.memory_space<vmem>>, %arg4: memref<32x128xf32, #tpu.memory_space<vmem>>) attributes {dimension_semantics = [#tpu.dimension_semantics<parallel>], iteration_bounds = array<i64: 1>, scalar_prefetch = 0 : i64, scratch_operands = 0 : i64, tpu.core_type = #tpu.core_type<tc>, window_params = [{transform_indices = @transform_0, window_bounds = array<i64: 32, 512>}, {pipeline_mode = #tpu.pipeline_mode<synchronous>, transform_indices = @transform_1, window_bounds = array<i64: 512, 16>}, {pipeline_mode = #tpu.pipeline_mode<synchronous>, transform_indices = @transform_2, window_bounds = array<i64: 16, 128>}, {transform_indices = @transform_3, window_bounds = array<i64: 32, 128>}]} {
    %c0 = arith.constant 0 : index
    %c0_0 = arith.constant 0 : index
    %0 = vector.load %arg1[%c0, %c0_0] : memref<32x512xbf16, #tpu.memory_space<vmem>>, vector<32x512xbf16>
    %c0_1 = arith.constant 0 : index
    %c0_2 = arith.constant 0 : index
    %1 = vector.load %arg2[%c0_1, %c0_2] : memref<512x16xbf16, #tpu.memory_space<vmem>>, vector<512x16xbf16>
    %cst = arith.constant dense<0.000000e+00> : vector<32x16xf32>
    %2 = tpu.matmul %0, %1, %cst {dimension_numbers = #tpu.dot_dimension_numbers<[1], [0], [0], [1], [0, 0, 1, 1], [], []>} : vector<32x512xbf16>, vector<512x16xbf16>, vector<32x16xf32> -> vector<32x16xf32>
    %3 = arith.truncf %2 : vector<32x16xf32> to vector<32x16xbf16>
    %c0_3 = arith.constant 0 : index
    %c0_4 = arith.constant 0 : index
    %4 = vector.load %arg3[%c0_3, %c0_4] : memref<16x128xbf16, #tpu.memory_space<vmem>>, vector<16x128xbf16>
    %cst_5 = arith.constant dense<0.000000e+00> : vector<32x128xf32>
    %5 = tpu.matmul %3, %4, %cst_5 {dimension_numbers = #tpu.dot_dimension_numbers<[1], [0], [0], [1], [0, 0, 1, 1], [], []>} : vector<32x16xbf16>, vector<16x128xbf16>, vector<32x128xf32> -> vector<32x128xf32>
    %c0_6 = arith.constant 0 : index
    %c0_7 = arith.constant 0 : index
    %6 = vector.load %arg4[%c0_6, %c0_7] : memref<32x128xf32, #tpu.memory_space<vmem>>, vector<32x128xf32>
    tpu.vector_store %arg4[%c0_6, %c0_7], %5 {strides = array<i32>} : memref<32x128xf32, #tpu.memory_space<vmem>>, vector<32x128xf32>,
    return
  }
  func.func @transform_0(%arg0: i32) -> (i32, i32) {
    %c0_i32 = arith.constant 0 : i32
    %c0_i32_0 = arith.constant 0 : i32
    return %arg0, %c0_i32 : i32, i32
  }
  func.func @transform_1(%arg0: i32) -> (i32, i32) {
    %c0_i32 = arith.constant 0 : i32
    %c0_i32_0 = arith.constant 0 : i32
    %c0_i32_1 = arith.constant 0 : i32
    return %c0_i32, %c0_i32_0 : i32, i32
  }
  func.func @transform_2(%arg0: i32) -> (i32, i32) {
    %c0_i32 = arith.constant 0 : i32
    %c0_i32_0 = arith.constant 0 : i32
    %c0_i32_1 = arith.constant 0 : i32
    return %c0_i32, %c0_i32_0 : i32, i32
  }
  func.func @transform_3(%arg0: i32) -> (i32, i32) {
    %c0_i32 = arith.constant 0 : i32
    %c0_i32_0 = arith.constant 0 : i32
    return %arg0, %c0_i32 : i32, i32
  }
}

module attributes {stable_mosaic.version = 11 : i64} {
  func.func @kernel(%arg0: i32, %arg1: i32, %arg2: memref<4x77x128xf32, #tpu.memory_space<vmem>>, %arg3: memref<2x1x2x4x16xbf16, #tpu.memory_space<vmem>>, %arg4: memref<2x16x128xbf16, #tpu.memory_space<vmem>>, %arg5: memref<1x4x77x128xf32, #tpu.memory_space<vmem>>) attributes {dimension_semantics = [#tpu.dimension_semantics<parallel>, #tpu.dimension_semantics<parallel>], iteration_bounds = array<i64: 2, 1>, scalar_prefetch = 0 : i64, scratch_operands = 0 : i64, tpu.core_type = #tpu.core_type<tc>, window_params = [{transform_indices = @transform_0, window_bounds = array<i64: 4, 77, 128>}, {transform_indices = @transform_1, window_bounds = array<i64: 2, 1, 2, 4, 16>}, {pipeline_mode = #tpu.pipeline_mode<synchronous>, transform_indices = @transform_2, window_bounds = array<i64: 2, 16, 128>}, {transform_indices = @transform_3, window_bounds = array<i64: 1, 4, 77, 128>}]} {
    %c0 = arith.constant 0 : index
    %c0_0 = arith.constant 0 : index
    %c0_1 = arith.constant 0 : index
    %0 = vector.load %arg2[%c0, %c0_0, %c0_1] : memref<4x77x128xf32, #tpu.memory_space<vmem>>, vector<4x77x128xf32>
    %c0_2 = arith.constant 0 : index
    %c0_3 = arith.constant 0 : index
    %c0_4 = arith.constant 0 : index
    %c0_5 = arith.constant 0 : index
    %1 = vector.load %arg5[%c0_2, %c0_3, %c0_4, %c0_5] : memref<1x4x77x128xf32, #tpu.memory_space<vmem>>, vector<1x4x77x128xf32>
    %2 = vector.shape_cast %1 : vector<1x4x77x128xf32> to vector<4x77x128xf32>
    %3 = vector.shape_cast %0 : vector<4x77x128xf32> to vector<1x4x77x128xf32>
    tpu.vector_store %arg5[%c0_2, %c0_3, %c0_4, %c0_5], %3 {strides = array<i32>} : memref<1x4x77x128xf32, #tpu.memory_space<vmem>>, vector<1x4x77x128xf32>,
    %c0_6 = arith.constant 0 : index
    %c0_7 = arith.constant 0 : index
    %c0_8 = arith.constant 0 : index
    %c0_9 = arith.constant 0 : index
    %c0_10 = arith.constant 0 : index
    %4 = vector.load %arg3[%c0_6, %c0_7, %c0_8, %c0_9, %c0_10] : memref<2x1x2x4x16xbf16, #tpu.memory_space<vmem>>, vector<1x1x1x4x16xbf16>
    %5 = vector.shape_cast %4 : vector<1x1x1x4x16xbf16> to vector<4x16xbf16>
    %c0_11 = arith.constant 0 : index
    %c0_12 = arith.constant 0 : index
    %c0_13 = arith.constant 0 : index
    %6 = vector.load %arg4[%c0_11, %c0_12, %c0_13] : memref<2x16x128xbf16, #tpu.memory_space<vmem>>, vector<1x16x128xbf16>
    %7 = vector.shape_cast %6 : vector<1x16x128xbf16> to vector<16x128xbf16>
    %cst = arith.constant dense<0.000000e+00> : vector<4x128xf32>
    %8 = tpu.matmul %5, %7, %cst {dimension_numbers = #tpu.dot_dimension_numbers<[1], [0], [0], [1], [0, 0, 1, 1], [], []>} : vector<4x16xbf16>, vector<16x128xbf16>, vector<4x128xf32> -> vector<4x128xf32>
    %9 = vector.extract_strided_slice %0 {offsets = [0, 5, 0], sizes = [4, 1, 128], strides = [1, 1, 1]} : vector<4x77x128xf32> to vector<4x1x128xf32>
    %10 = vector.shape_cast %9 : vector<4x1x128xf32> to vector<4x128xf32>
    %11 = arith.addf %10, %8 : vector<4x128xf32>
    %c0_14 = arith.constant 0 : index
    %c0_15 = arith.constant 0 : index
    %c5 = arith.constant 5 : index
    %c0_16 = arith.constant 0 : index
    %12 = vector.load %arg5[%c0_14, %c0_15, %c5, %c0_16] : memref<1x4x77x128xf32, #tpu.memory_space<vmem>>, vector<1x4x1x128xf32>
    %13 = vector.shape_cast %12 : vector<1x4x1x128xf32> to vector<4x128xf32>
    %14 = vector.shape_cast %11 : vector<4x128xf32> to vector<1x4x1x128xf32>
    tpu.vector_store %arg5[%c0_14, %c0_15, %c5, %c0_16], %14 {strides = array<i32>} : memref<1x4x77x128xf32, #tpu.memory_space<vmem>>, vector<1x4x1x128xf32>,
    %c0_17 = arith.constant 0 : index
    %c0_18 = arith.constant 0 : index
    %c1 = arith.constant 1 : index
    %c0_19 = arith.constant 0 : index
    %c0_20 = arith.constant 0 : index
    %15 = vector.load %arg3[%c0_17, %c0_18, %c1, %c0_19, %c0_20] : memref<2x1x2x4x16xbf16, #tpu.memory_space<vmem>>, vector<1x1x1x4x16xbf16>
    %16 = vector.shape_cast %15 : vector<1x1x1x4x16xbf16> to vector<4x16xbf16>
    %c0_21 = arith.constant 0 : index
    %c0_22 = arith.constant 0 : index
    %c0_23 = arith.constant 0 : index
    %17 = vector.load %arg4[%c0_21, %c0_22, %c0_23] : memref<2x16x128xbf16, #tpu.memory_space<vmem>>, vector<1x16x128xbf16>
    %18 = vector.shape_cast %17 : vector<1x16x128xbf16> to vector<16x128xbf16>
    %cst_24 = arith.constant dense<0.000000e+00> : vector<4x128xf32>
    %19 = tpu.matmul %16, %18, %cst_24 {dimension_numbers = #tpu.dot_dimension_numbers<[1], [0], [0], [1], [0, 0, 1, 1], [], []>} : vector<4x16xbf16>, vector<16x128xbf16>, vector<4x128xf32> -> vector<4x128xf32>
    %20 = vector.extract_strided_slice %0 {offsets = [0, 6, 0], sizes = [4, 1, 128], strides = [1, 1, 1]} : vector<4x77x128xf32> to vector<4x1x128xf32>
    %21 = vector.shape_cast %20 : vector<4x1x128xf32> to vector<4x128xf32>
    %22 = arith.addf %21, %19 : vector<4x128xf32>
    %c0_25 = arith.constant 0 : index
    %c0_26 = arith.constant 0 : index
    %c6 = arith.constant 6 : index
    %c0_27 = arith.constant 0 : index
    %23 = vector.load %arg5[%c0_25, %c0_26, %c6, %c0_27] : memref<1x4x77x128xf32, #tpu.memory_space<vmem>>, vector<1x4x1x128xf32>
    %24 = vector.shape_cast %23 : vector<1x4x1x128xf32> to vector<4x128xf32>
    %25 = vector.shape_cast %22 : vector<4x128xf32> to vector<1x4x1x128xf32>
    tpu.vector_store %arg5[%c0_25, %c0_26, %c6, %c0_27], %25 {strides = array<i32>} : memref<1x4x77x128xf32, #tpu.memory_space<vmem>>, vector<1x4x1x128xf32>,
    %c1_28 = arith.constant 1 : index
    %c0_29 = arith.constant 0 : index
    %c0_30 = arith.constant 0 : index
    %c0_31 = arith.constant 0 : index
    %c0_32 = arith.constant 0 : index
    %26 = vector.load %arg3[%c1_28, %c0_29, %c0_30, %c0_31, %c0_32] : memref<2x1x2x4x16xbf16, #tpu.memory_space<vmem>>, vector<1x1x1x4x16xbf16>
    %27 = vector.shape_cast %26 : vector<1x1x1x4x16xbf16> to vector<4x16xbf16>
    %c1_33 = arith.constant 1 : index
    %c0_34 = arith.constant 0 : index
    %c0_35 = arith.constant 0 : index
    %28 = vector.load %arg4[%c1_33, %c0_34, %c0_35] : memref<2x16x128xbf16, #tpu.memory_space<vmem>>, vector<1x16x128xbf16>
    %29 = vector.shape_cast %28 : vector<1x16x128xbf16> to vector<16x128xbf16>
    %cst_36 = arith.constant dense<0.000000e+00> : vector<4x128xf32>
    %30 = tpu.matmul %27, %29, %cst_36 {dimension_numbers = #tpu.dot_dimension_numbers<[1], [0], [0], [1], [0, 0, 1, 1], [], []>} : vector<4x16xbf16>, vector<16x128xbf16>, vector<4x128xf32> -> vector<4x128xf32>
    %31 = vector.extract_strided_slice %0 {offsets = [0, 11, 0], sizes = [4, 1, 128], strides = [1, 1, 1]} : vector<4x77x128xf32> to vector<4x1x128xf32>
    %32 = vector.shape_cast %31 : vector<4x1x128xf32> to vector<4x128xf32>
    %33 = arith.addf %32, %30 : vector<4x128xf32>
    %c0_37 = arith.constant 0 : index
    %c0_38 = arith.constant 0 : index
    %c11 = arith.constant 11 : index
    %c0_39 = arith.constant 0 : index
    %34 = vector.load %arg5[%c0_37, %c0_38, %c11, %c0_39] : memref<1x4x77x128xf32, #tpu.memory_space<vmem>>, vector<1x4x1x128xf32>
    %35 = vector.shape_cast %34 : vector<1x4x1x128xf32> to vector<4x128xf32>
    %36 = vector.shape_cast %33 : vector<4x128xf32> to vector<1x4x1x128xf32>
    tpu.vector_store %arg5[%c0_37, %c0_38, %c11, %c0_39], %36 {strides = array<i32>} : memref<1x4x77x128xf32, #tpu.memory_space<vmem>>, vector<1x4x1x128xf32>,
    %c1_40 = arith.constant 1 : index
    %c0_41 = arith.constant 0 : index
    %c1_42 = arith.constant 1 : index
    %c0_43 = arith.constant 0 : index
    %c0_44 = arith.constant 0 : index
    %37 = vector.load %arg3[%c1_40, %c0_41, %c1_42, %c0_43, %c0_44] : memref<2x1x2x4x16xbf16, #tpu.memory_space<vmem>>, vector<1x1x1x4x16xbf16>
    %38 = vector.shape_cast %37 : vector<1x1x1x4x16xbf16> to vector<4x16xbf16>
    %c1_45 = arith.constant 1 : index
    %c0_46 = arith.constant 0 : index
    %c0_47 = arith.constant 0 : index
    %39 = vector.load %arg4[%c1_45, %c0_46, %c0_47] : memref<2x16x128xbf16, #tpu.memory_space<vmem>>, vector<1x16x128xbf16>
    %40 = vector.shape_cast %39 : vector<1x16x128xbf16> to vector<16x128xbf16>
    %cst_48 = arith.constant dense<0.000000e+00> : vector<4x128xf32>
    %41 = tpu.matmul %38, %40, %cst_48 {dimension_numbers = #tpu.dot_dimension_numbers<[1], [0], [0], [1], [0, 0, 1, 1], [], []>} : vector<4x16xbf16>, vector<16x128xbf16>, vector<4x128xf32> -> vector<4x128xf32>
    %42 = vector.extract_strided_slice %0 {offsets = [0, 12, 0], sizes = [4, 1, 128], strides = [1, 1, 1]} : vector<4x77x128xf32> to vector<4x1x128xf32>
    %43 = vector.shape_cast %42 : vector<4x1x128xf32> to vector<4x128xf32>
    %44 = arith.addf %43, %41 : vector<4x128xf32>
    %c0_49 = arith.constant 0 : index
    %c0_50 = arith.constant 0 : index
    %c12 = arith.constant 12 : index
    %c0_51 = arith.constant 0 : index
    %45 = vector.load %arg5[%c0_49, %c0_50, %c12, %c0_51] : memref<1x4x77x128xf32, #tpu.memory_space<vmem>>, vector<1x4x1x128xf32>
    %46 = vector.shape_cast %45 : vector<1x4x1x128xf32> to vector<4x128xf32>
    %47 = vector.shape_cast %44 : vector<4x128xf32> to vector<1x4x1x128xf32>
    tpu.vector_store %arg5[%c0_49, %c0_50, %c12, %c0_51], %47 {strides = array<i32>} : memref<1x4x77x128xf32, #tpu.memory_space<vmem>>, vector<1x4x1x128xf32>,
    return
  }
  func.func @transform_0(%arg0: i32, %arg1: i32) -> (i32, i32, i32) {
    %c0_i32 = arith.constant 0 : i32
    %c0_i32_0 = arith.constant 0 : i32
    %c0_i32_1 = arith.constant 0 : i32
    return %arg1, %c0_i32, %c0_i32_0 : i32, i32, i32
  }
  func.func @transform_1(%arg0: i32, %arg1: i32) -> (i32, i32, i32, i32, i32) {
    %c0_i32 = arith.constant 0 : i32
    %c0_i32_0 = arith.constant 0 : i32
    %c0_i32_1 = arith.constant 0 : i32
    %c0_i32_2 = arith.constant 0 : i32
    return %c0_i32, %arg0, %c0_i32_0, %arg1, %c0_i32_1 : i32, i32, i32, i32, i32
  }
  func.func @transform_2(%arg0: i32, %arg1: i32) -> (i32, i32, i32) {
    %c0_i32 = arith.constant 0 : i32
    %c0_i32_0 = arith.constant 0 : i32
    %c0_i32_1 = arith.constant 0 : i32
    %c0_i32_2 = arith.constant 0 : i32
    return %c0_i32, %c0_i32_0, %c0_i32_1 : i32, i32, i32
  }
  func.func @transform_3(%arg0: i32, %arg1: i32) -> (i32, i32, i32, i32) {
    %c0_i32 = arith.constant 0 : i32
    %c0_i32_0 = arith.constant 0 : i32
    %c0_i32_1 = arith.constant 0 : i32
    return %arg0, %arg1, %c0_i32, %c0_i32_0 : i32, i32, i32, i32
  }
}

</mosaic_0001>

<bundles_post_ra>
// kernel: vl_prompt_learner_forward.3
= control target key start
LH: loop header
LB: loop body
LE: loop exit
PB: predicated region body
PF: predicated region fallthrough
CT: control target
= control target key end

     0   :  { %s921_s12 = smov 0   ;;  %s923_s13 = smov 0   ;;  %s1198_s0 = inlined_call_operand.vmem [shape: f32[4,77,128], index: 0, kind: input, shape index: {}]   ;;  %s1199_s1 = inlined_call_operand.vmem [shape: bf16[2,2,2,4,16], index: 1, kind: input, shape index: {}]   ;;  %s1200_s2 = inlined_call_operand.vmem [shape: bf16[2,16,128], index: 2, kind: input, shape index: {}]   ;;  %s1201_s3 = inlined_call_operand.vmem [shape: f32[2,4,77,128], index: 3, kind: output, shape index: {}]  }
   0x1   :  { %s925_s14 = smov 0   ;;  %s927_s15 = smov 0  }
   0x2   :  { %s929_s16 = smov 0  }
   0x3 LB: > { %s25_s17 = sadd.s32 1, %s893_s15  ;;  %p67_p1 = scmp.ne.s32.totalorder %s885_s13, %s881_s12  ;;  %s897_s16 = sphi %s929_s16, %s13_s16   ;;  %s893_s15 = sphi %s927_s15, %s1205_s15   ;;  %s889_s14 = sphi %s925_s14, %s1204_s14   ;;  %s885_s13 = sphi %s923_s13, %s1203_s13   ;;  %s881_s12 = sphi %s921_s12, %s1202_s12  }
   0x4   : > { %p27_p0 = scmp.ge.s32.totalorder %s25_s17, 2  ;;  %p68_p2 = scmp.eq.s32.totalorder %s897_s16, 0 }
   0x5   : > { %s60_s19 = sadd.s32 1, %s885_s13  ;;  %p755_p5 = scmp.ge.s32.totalorder %s897_s16, 2 }
   0x6   : > { %s1207_s17 = smov (%p27_p0, %s25_s17), 0  ;;  %p69_p3 = por %p68_p2, %p67_p1 }
   0x7   : > { %s55_s18 = ssub.s32 %s893_s15, %s1207_s17  ;;  %155 = sbr.rel (%p755_p5) target bundleno = 17 (0x11), region = 24 }
   0x8   : > { %p58_p4 = scmp.eq.s32.totalorder %s55_s18, 0 }
   0xa   : > { %s956_s20 = scalar_select %p58_p4, %s885_s13, %s60_s19  }
   0xc   : > { %158 = sbr.rel (!%p69_p3) target bundleno = 17 (0x11), region = 28  ;;  %s160_s21 = sand.u32 (%p69_p3), 1, %s885_s13  }
   0xd   : > { %s779_s22 = sshll.u32 (%p69_p3), %s893_s15, 2  ;;  %s756_s23 = sshll.u32 (%p69_p3), %s160_s21, 3 }
   0xe   : > { %s166_s26 = scalar_lea.vmem (%p69_p3), %s1199_s1, %s779_s22  ;;  %s162_s27 = scalar_lea.vmem (%p69_p3), [#allocation2], %s756_s23 }
   0xf   : > { %v183_v0 = vld [vmem:[%s166_s26] sm:$0xf] (%p69_p3)   ;;  %v187_v1 = vld [vmem:[%s166_s26 + $0x8] sm:$0xf] (%p69_p3)  }
  0x10   : > { %184 = vst [vmem:[%s162_s27] sm:$0xf] (%p69_p3), %v183_v0   ;;  %188 = vst [vmem:[%s162_s27 + $0x4] sm:$0xf] (%p69_p3), %v187_v1  }
  0x11 PF: > { %p759_p6 = scmp.ge.s32.totalorder %s897_s16, 1  ;;  %p221_p7 = scmp.lt.s32.totalorder %s897_s16, 3 }
  0x13   : > { %p222_p8 = pnand %p759_p6, %p221_p7 }
  0x14   : > { %p270_p9 = scmp.lt.s32.totalorder (!%p222_p8), %s889_s14, 1  ;;  %s228_s28 = sand.u32 (!%p222_p8), 1, %s881_s12  }
  0x15   : > { %225 = sbr.rel (%p222_p8) target bundleno = 250 (0xfa), region = 69  ;;  %s1040_s5 = sshll.u32 (!%p222_p8), %s228_s28, 3 }
  0x16   : > { %s230_s19 = scalar_lea.vmem (!%p222_p8), [#allocation2], %s1040_s5 }
  0x1a   : > { %v899_v2 = vmov 0.0   ;;  %vm900_vm0 = vmmov 0   ;;  %v283_v3 = vld [vmem:[%s1198_s0 + $0x10] sm:$0xff]  ;;  %v284_v4 = vld [vmem:[%s1198_s0 + $0x18] sm:$0xff]  ;;  %v285_v5 = vld [vmem:[%s1198_s0 + $0x20] sm:$0xff]  ;;  %s1209_s14 = smov (!%p270_p9, %s889_s14), 1 }
  0x1b   : > { %788 = vmatprep.subr.bf16.mxu0 %v899_v2  ;;  %794 = vmatprep.subr.bf16.mxu1 %v899_v2  ;;  %v286_v6 = vld [vmem:[%s1198_s0 + $0x28] sm:$0xff]  ;;  %v287_v7 = vld [vmem:[%s1198_s0 + $0x30] sm:$0xff]  ;;  %v288_v8 = vld [vmem:[%s1198_s0 + $0x38] sm:$0xff]  ;;  %s812_s24 = smul.u32 320, %s1209_s14  ;;  %vm370_vm1 = vcmask 130048  }
  0x1c   : > { %790 = vmatprep.mubr.msk.bf16.mxu0 %vm900_vm0, %v899_v2  ;;  %796 = vmatprep.mubr.msk.bf16.mxu1 %vm900_vm0, %v899_v2  ;;  %v289_v9 = vld [vmem:[%s1198_s0 + $0x40] sm:$0xff]  ;;  %v290_v10 = vld [vmem:[%s1198_s0 + $0x48] sm:$0x1f]  ;;  %v295_v13 = vld [vmem:[%s1198_s0 + $0x70] sm:$0xff] }
  0x1d   : > { %v293_v11 = vld [vmem:[%s1198_s0 + $0x60] sm:$0xff]  ;;  %v294_v12 = vld [vmem:[%s1198_s0 + $0x68] sm:$0xff]  ;;  %v296_v14 = vld [vmem:[%s1198_s0 + $0x78] sm:$0xff]  ;;  %s1054_s18 = scalar_lea.vmem %s1201_s3, %s812_s24 }
  0x1e   : > { %v297_v15 = vld [vmem:[%s1198_s0 + $0x80] sm:$0xff]  ;;  %v298_v16 = vld [vmem:[%s1198_s0 + $0x88] sm:$0xff]  ;;  %v299_v17 = vld [vmem:[%s1198_s0 + $0x90] sm:$0xff]  ;;  %323 = vst [vmem:[%s1054_s18 + $0x10] sm:$0xff] %v283_v3 }
  0x1f   : > { %v300_v18 = vld [vmem:[%s1198_s0 + $0x98] sm:$0x1f]  ;;  %v303_v19 = vld [vmem:[%s1198_s0 + $0xb0] sm:$0xff]  ;;  %v305_v21 = vld [vmem:[%s1198_s0 + $0xc0] sm:$0xff]  ;;  %324 = vst [vmem:[%s1054_s18 + $0x18] sm:$0xff] %v284_v4 }
  0x20   : > { %v304_v20 = vld [vmem:[%s1198_s0 + $0xb8] sm:$0xff]  ;;  %v306_v22 = vld [vmem:[%s1198_s0 + $0xc8] sm:$0xff]  ;;  %v307_v23 = vld [vmem:[%s1198_s0 + $0xd0] sm:$0xff]  ;;  %325 = vst [vmem:[%s1054_s18 + $0x20] sm:$0xff] %v285_v5 }
  0x21   : > { %v308_v24 = vld [vmem:[%s1198_s0 + $0xd8] sm:$0xff]  ;;  %v309_v25 = vld [vmem:[%s1198_s0 + $0xe0] sm:$0xff]  ;;  %v310_v26 = vld [vmem:[%s1198_s0 + $0xe8] sm:$0x1f]  ;;  %326 = vst [vmem:[%s1054_s18 + $0x28] sm:$0xff] %v286_v6 }
  0x22   : > { %v313_v27 = vld [vmem:[%s1198_s0 + $0x100] sm:$0xff]  ;;  %v314_v28 = vld [vmem:[%s1198_s0 + $0x108] sm:$0xff]  ;;  %v315_v29 = vld [vmem:[%s1198_s0 + $0x110] sm:$0xff]  ;;  %327 = vst [vmem:[%s1054_s18 + $0x30] sm:$0xff] %v287_v7 }
  0x23   : > { %328 = vst [vmem:[%s1054_s18 + $0x38] sm:$0xff] %v288_v8  ;;  %329 = vst [vmem:[%s1054_s18 + $0x40] sm:$0xff] %v289_v9  ;;  %v316_v30 = vld [vmem:[%s1198_s0 + $0x118] sm:$0xff]  ;;  %v317_v31 = vld [vmem:[%s1198_s0 + $0x120] sm:$0xff] }
  0x24   : > { %330 = vst [vmem:[%s1054_s18 + $0x48] sm:$0x1f] %v290_v10  ;;  %333 = vst [vmem:[%s1054_s18 + $0x60] sm:$0xff] %v293_v11  ;;  %v318_v32 = vld [vmem:[%s1198_s0 + $0x128] sm:$0xff]  ;;  %v319_v33 = vld [vmem:[%s1198_s0 + $0x130] sm:$0xff] }
  0x25   : > { %334 = vst [vmem:[%s1054_s18 + $0x68] sm:$0xff] %v294_v12  ;;  %335 = vst [vmem:[%s1054_s18 + $0x70] sm:$0xff] %v295_v13  ;;  %v320_v34 = vld [vmem:[%s1198_s0 + $0x138] sm:$0x1f]  ;;  %v855_v35 = vld [vmem:[%s1200_s2] sm:$0xff]  }
  0x26   : > { %336 = vst [vmem:[%s1054_s18 + $0x78] sm:$0xff] %v296_v14  ;;  %337 = vst [vmem:[%s1054_s18 + $0x80] sm:$0xff] %v297_v15  ;;  %v856_v36 = vld [vmem:[%s1200_s2] sm:$0xff]   ;;  %789 = vmatpush3.bf16.msra.mxu0 %v855_v35  ;;  %v857_v39 = vld [vmem:[%s1200_s2 + $0x8] sm:$0xff]  }
  0x27   : > { %338 = vst [vmem:[%s1054_s18 + $0x88] sm:$0xff] %v298_v16  ;;  %339 = vst [vmem:[%s1054_s18 + $0x90] sm:$0xff] %v299_v17  ;;  %v361_v37 = vld [vmem:[%s230_s19] sm:$0x3]  ;;  %v764_v38 = vld [vmem:[%s230_s19 + $0x2] sm:$0x3]  ;;  %795 = vmatpush3.bf16.msra.mxu1 %v856_v36  ;;  %800 = vmatprep.subr.bf16.mxu0 %v899_v2 }
  0x28   : > { %340 = vst [vmem:[%s1054_s18 + $0x98] sm:$0x1f] %v300_v18  ;;  %343 = vst [vmem:[%s1054_s18 + $0xb0] sm:$0xff] %v303_v19  ;;  %806 = vmatprep.subr.bf16.mxu1 %v899_v2  ;;  %v858_v40 = vld [vmem:[%s1200_s2 + $0x8] sm:$0xff]   ;;  %v281_v41 = vld [vmem:[%s1198_s0] sm:$0xff] }
  0x29   : > { %344 = vst [vmem:[%s1054_s18 + $0xb8] sm:$0xff] %v304_v20  ;;  %345 = vst [vmem:[%s1054_s18 + $0xc0] sm:$0xff] %v305_v21  ;;  %791 = vmatmul.mubr.msk.bf16.vlgmr.msra.gmra.mxu0 %vm370_vm1, %v361_v37  ;;  %v291_v42 = vld [vmem:[%s1198_s0 + $0x50] sm:$0xff]  ;;  %v301_v43 = vld [vmem:[%s1198_s0 + $0xa0] sm:$0xff] }
  0x2a   : > { %346 = vst [vmem:[%s1054_s18 + $0xc8] sm:$0xff] %v306_v22  ;;  %347 = vst [vmem:[%s1054_s18 + $0xd0] sm:$0xff] %v307_v23  ;;  %797 = vmatmul.mubr.msk.bf16.vlgmr.msra.gmra.mxu1 %vm370_vm1, %v764_v38  ;;  %801 = vmatpush3.bf16.msra.mxu0 %v857_v39  ;;  %v311_v44 = vld [vmem:[%s1198_s0 + $0xf0] sm:$0xff]  ;;  %v767_v45 = vld [vmem:[%s230_s19 + $0x4] sm:$0x3] }
  0x2b   : > { %348 = vst [vmem:[%s1054_s18 + $0xd8] sm:$0xff] %v308_v24  ;;  %349 = vst [vmem:[%s1054_s18 + $0xe0] sm:$0xff] %v309_v25  ;;  %807 = vmatpush3.bf16.msra.mxu1 %v858_v40  ;;  %802 = vmatprep.mubr.msk.bf16.mxu0 %vm900_vm0, %v899_v2  ;;  %v772_v46 = vld [vmem:[%s230_s19 + $0x6] sm:$0x3]  ;;  %v292_v48 = vld [vmem:[%s1198_s0 + $0x58] sm:$0xff] }
  0x2c   : > { %350 = vst [vmem:[%s1054_s18 + $0xe8] sm:$0x1f] %v310_v26  ;;  %353 = vst [vmem:[%s1054_s18 + $0x100] sm:$0xff] %v313_v27  ;;  %808 = vmatprep.mubr.msk.bf16.mxu1 %vm900_vm0, %v899_v2  ;;  %v282_v47 = vld [vmem:[%s1198_s0 + $0x8] sm:$0xff]  ;;  %v312_v50 = vld [vmem:[%s1198_s0 + $0xf8] sm:$0xff] }
  0x2d   : > { %354 = vst [vmem:[%s1054_s18 + $0x108] sm:$0xff] %v314_v28  ;;  %355 = vst [vmem:[%s1054_s18 + $0x110] sm:$0xff] %v315_v29  ;;  %v302_v49 = vld [vmem:[%s1198_s0 + $0xa8] sm:$0xff] }
  0x2e   : > { %356 = vst [vmem:[%s1054_s18 + $0x118] sm:$0xff] %v316_v30  ;;  %357 = vst [vmem:[%s1054_s18 + $0x120] sm:$0xff] %v317_v31 }
  0x2f   : > { %358 = vst [vmem:[%s1054_s18 + $0x128] sm:$0xff] %v318_v32  ;;  %359 = vst [vmem:[%s1054_s18 + $0x130] sm:$0xff] %v319_v33 }
  0x30   : > { %360 = vst [vmem:[%s1054_s18 + $0x138] sm:$0x1f] %v320_v34  ;;  %321 = vst [vmem:[%s1054_s18] sm:$0xff] %v281_v41 }
  0x31   : > { %331 = vst [vmem:[%s1054_s18 + $0x50] sm:$0xff] %v291_v42  ;;  %341 = vst [vmem:[%s1054_s18 + $0xa0] sm:$0xff] %v301_v43  ;;  %803 = vmatmul.mubr.msk.bf16.vlgmr.msra.gmra.mxu0 %vm370_vm1, %v767_v45 }
  0x32   : > { %351 = vst [vmem:[%s1054_s18 + $0xf0] sm:$0xff] %v311_v44  ;;  %809 = vmatmul.mubr.msk.bf16.vlgmr.msra.gmra.mxu1 %vm370_vm1, %v772_v46  ;;  %322 = vst [vmem:[%s1054_s18 + $0x8] sm:$0xff] %v282_v47 }
  0x33   : > { %332 = vst [vmem:[%s1054_s18 + $0x58] sm:$0xff] %v292_v48  ;;  %342 = vst [vmem:[%s1054_s18 + $0xa8] sm:$0xff] %v302_v49 }
  0x34   : > { %352 = vst [vmem:[%s1054_s18 + $0xf8] sm:$0xff] %v312_v50 }
  0xe9   : > { %v408_v51 = vpop.f32.mrf.mxu0 }
  0xea   : > { %v415_v52 = vrot.slane %v408_v51, 3  ;;  %v416_v53 = vrot.slane %v408_v51, 4  ;;  %v417_v54 = vrot.slane %v408_v51, 5  ;;  %v418_v55 = vrot.slane %v408_v51, 6  ;;  %v478_v56 = vpop.f32.mrf.mxu1 }
  0xeb   : > { %v485_v57 = vrot.slane %v478_v56, 2  ;;  %v486_v58 = vrot.slane %v478_v56, 3  ;;  %v487_v59 = vrot.slane %v478_v56, 4  ;;  %v488_v60 = vrot.slane %v478_v56, 5  ;;  %v792_v61 = vpop.f32.mrf.mxu0 }
  0xec   : > { %v423_v62 = vadd.f32 %v415_v52, %v281_v41  ;;  %v424_v63 = vadd.f32 %v416_v53, %v291_v42  ;;  %v425_v0 = vadd.f32 %v417_v54, %v301_v43  ;;  %v426_v1 = vadd.f32 %v418_v55, %v311_v44  ;;  %v798_v2 = vpop.f32.mrf.mxu1 }
  0xed   : > { %v493_v3 = vadd.f32 %v485_v57, %v281_v41  ;;  %v494_v4 = vadd.f32 %v486_v58, %v291_v42  ;;  %v495_v5 = vadd.f32 %v487_v59, %v301_v43  ;;  %v496_v6 = vadd.f32 %v488_v60, %v311_v44  ;;  %v411_v7 = vpop.f32.mrf.mxu0 }
  0xee   : > { %427 = vst [vmem:[%s1054_s18] sm:$0x20] %v423_v62  ;;  %428 = vst [vmem:[%s1054_s18 + $0x50] sm:$0x20] %v424_v63  ;;  %v481_v8 = vpop.f32.mrf.mxu1 }
  0xef   : > { %429 = vst [vmem:[%s1054_s18 + $0xa0] sm:$0x20] %v425_v0  ;;  %430 = vst [vmem:[%s1054_s18 + $0xf0] sm:$0x20] %v426_v1  ;;  %v793_v9 = vpop.f32.mrf.mxu0 }
  0xf0   : > { %497 = vst [vmem:[%s1054_s18] sm:$0x40] %v493_v3  ;;  %498 = vst [vmem:[%s1054_s18 + $0x50] sm:$0x40] %v494_v4  ;;  %v799_v10 = vpop.f32.mrf.mxu1 }
  0xf1   : > { %499 = vst [vmem:[%s1054_s18 + $0xa0] sm:$0x40] %v495_v5  ;;  %500 = vst [vmem:[%s1054_s18 + $0xf0] sm:$0x40] %v496_v6  ;;  %v549_v11 = vpop.f32.mrf.mxu0 }
  0xf2   : > { %v556_v12 = vrot.slane %v549_v11, 5  ;;  %v557_v13 = vrot.slane %v549_v11, 6  ;;  %v558_v14 = vrot.slane %v549_v11, 7  ;;  %v566_v15 = vadd.f32 %v549_v11, %v312_v50  ;;  %v618_v16 = vpop.f32.mrf.mxu1 }
  0xf3   : > { %v625_v17 = vrot.slane %v618_v16, 4  ;;  %v626_v18 = vrot.slane %v618_v16, 5  ;;  %v627_v19 = vrot.slane %v618_v16, 6  ;;  %v628_v20 = vrot.slane %v618_v16, 7  ;;  %v804_v21 = vpop.f32.mrf.mxu0 }
  0xf4   : > { %v563_v22 = vadd.f32 %v556_v12, %v282_v47  ;;  %v564_v23 = vadd.f32 %v557_v13, %v292_v48  ;;  %v565_v24 = vadd.f32 %v558_v14, %v302_v49  ;;  %570 = vst [vmem:[%s1054_s18 + $0xf8] sm:$0x8] %v566_v15  ;;  %v810_v25 = vpop.f32.mrf.mxu1 }
  0xf5   : > { %v633_v26 = vadd.f32 %v625_v17, %v282_v47  ;;  %v634_v27 = vadd.f32 %v626_v18, %v292_v48  ;;  %v635_v28 = vadd.f32 %v627_v19, %v302_v49  ;;  %v636_v29 = vadd.f32 %v628_v20, %v312_v50  ;;  %v552_v30 = vpop.f32.mrf.mxu0 }
  0xf6   : > { %567 = vst [vmem:[%s1054_s18 + $0x8] sm:$0x8] %v563_v22  ;;  %568 = vst [vmem:[%s1054_s18 + $0x58] sm:$0x8] %v564_v23  ;;  %v621_v31 = vpop.f32.mrf.mxu1 }
  0xf7   : > { %569 = vst [vmem:[%s1054_s18 + $0xa8] sm:$0x8] %v565_v24  ;;  %637 = vst [vmem:[%s1054_s18 + $0x8] sm:$0x10] %v633_v26  ;;  %v805_v32 = vpop.f32.mrf.mxu0 }
  0xf8   : > { %638 = vst [vmem:[%s1054_s18 + $0x58] sm:$0x10] %v634_v27  ;;  %639 = vst [vmem:[%s1054_s18 + $0xa8] sm:$0x10] %v635_v28  ;;  %v811_v33 = vpop.f32.mrf.mxu1 }
  0xf9   : > { %640 = vst [vmem:[%s1054_s18 + $0xf8] sm:$0x10] %v636_v29 }
  0xfa PF: > { %s13_s16 = sadd.s32 1, %s897_s16   ;;  %s1202_s12 = smov %s885_s13 }
  0xfb   : > { %p10_p10 = scmp.ge.s32.totalorder %s13_s16, 4   ;;  %s1203_s13 = smov %s956_s20 }
  0xfc   : > { %s1204_s14 = smov %s893_s15  ;;  %s1205_s15 = smov %s1207_s17 }
  0xfd   :  { %12 = sbr.rel (!%p10_p10) target bundleno = 3 (0x3), region = 115 }

// kernel: vl_prompt_learner_forward.2
= control target key start
LH: loop header
LB: loop body
LE: loop exit
PB: predicated region body
PF: predicated region fallthrough
CT: control target
= control target key end

     0   :  { %vm427_vm0 = vcmask 130048   ;;  %s799_s1 = inlined_call_operand.vmem [shape: bf16[512,16], index: 1, kind: input, shape index: {}]   ;;  %s800_s0 = inlined_call_operand.vmem [shape: bf16[32,512], index: 0, kind: input, shape index: {}]   ;;  %s801_s2 = inlined_call_operand.vmem [shape: bf16[16,128], index: 2, kind: input, shape index: {}]   ;;  %s802_s3 = inlined_call_operand.vmem [shape: f32[32,128], index: 3, kind: output, shape index: {}]  }
   0x1   :  { %v599_v0 = vld [vmem:[%s799_s1 + $0x78] sm:$0xff]   ;;  %v603_v4 = vld [vmem:[%s799_s1 + $0x70] sm:$0xff]   ;;  %v607_v8 = vld [vmem:[%s799_s1 + $0x68] sm:$0xff]  }
   0x2   :  { %v600_v1 = vld [vmem:[%s799_s1 + $0xf8] sm:$0xff]   ;;  %534 = vmatprep.subr.bf16.mxu0 %v599_v0  ;;  %v604_v5 = vld [vmem:[%s799_s1 + $0xf0] sm:$0xff]   ;;  %v608_v9 = vld [vmem:[%s799_s1 + $0xe8] sm:$0xff]  }
   0x3   :  { %v601_v2 = vld [vmem:[%s799_s1 + $0x38] sm:$0xff]   ;;  %562 = vmatprep.subr.bf16.mxu1 %v600_v1  ;;  %v605_v6 = vld [vmem:[%s799_s1 + $0x30] sm:$0xff]   ;;  %v609_v10 = vld [vmem:[%s799_s1 + $0x28] sm:$0xff]  }
   0x4   :  { %v602_v3 = vld [vmem:[%s799_s1 + $0xb8] sm:$0xff]   ;;  %535 = vmatpush3.bf16.msra.mxu0 %v601_v2  ;;  %v606_v7 = vld [vmem:[%s799_s1 + $0xb0] sm:$0xff]   ;;  %v610_v11 = vld [vmem:[%s799_s1 + $0xa8] sm:$0xff]  }
   0x5   :  { %563 = vmatpush3.bf16.msra.mxu1 %v602_v3  ;;  %536 = vmatprep.subr.bf16.mxu0 %v603_v4  ;;  %v611_v12 = vld [vmem:[%s799_s1 + $0x60] sm:$0xff]   ;;  %v615_v16 = vld [vmem:[%s799_s1 + $0x58] sm:$0xff]   ;;  %v619_v20 = vld [vmem:[%s799_s1 + $0x50] sm:$0xff]  }
   0x6   :  { %564 = vmatprep.subr.bf16.mxu1 %v604_v5  ;;  %v612_v13 = vld [vmem:[%s799_s1 + $0xe0] sm:$0xff]   ;;  %v616_v17 = vld [vmem:[%s799_s1 + $0xd8] sm:$0xff]   ;;  %v620_v21 = vld [vmem:[%s799_s1 + $0xd0] sm:$0xff]  }
   0x7   :  { %v613_v14 = vld [vmem:[%s799_s1 + $0x20] sm:$0xff]   ;;  %v617_v18 = vld [vmem:[%s799_s1 + $0x18] sm:$0xff]   ;;  %v621_v22 = vld [vmem:[%s799_s1 + $0x10] sm:$0xff]  }
   0x8   :  { %537 = vmatpush3.bf16.msra.mxu0 %v605_v6  ;;  %v614_v15 = vld [vmem:[%s799_s1 + $0xa0] sm:$0xff]   ;;  %v618_v19 = vld [vmem:[%s799_s1 + $0x98] sm:$0xff]   ;;  %v622_v23 = vld [vmem:[%s799_s1 + $0x90] sm:$0xff]  }
   0x9   :  { %565 = vmatpush3.bf16.msra.mxu1 %v606_v7  ;;  %538 = vmatprep.subr.bf16.mxu0 %v607_v8  ;;  %v623_v24 = vld [vmem:[%s799_s1 + $0x48] sm:$0xff]   ;;  %v627_v28 = vld [vmem:[%s799_s1 + $0x40] sm:$0xff]  }
   0xa   :  { %566 = vmatprep.subr.bf16.mxu1 %v608_v9  ;;  %v624_v25 = vld [vmem:[%s799_s1 + $0xc8] sm:$0xff]   ;;  %v628_v29 = vld [vmem:[%s799_s1 + $0xc0] sm:$0xff]  }
   0xb   :  { %v625_v26 = vld [vmem:[%s799_s1 + $0x8] sm:$0xff]   ;;  %v629_v30 = vld [vmem:[%s799_s1] sm:$0xff]  }
   0xc   :  { %539 = vmatpush3.bf16.msra.mxu0 %v609_v10  ;;  %v626_v27 = vld [vmem:[%s799_s1 + $0x88] sm:$0xff]   ;;  %v630_v31 = vld [vmem:[%s799_s1 + $0x80] sm:$0xff]  }
   0xd   :  { %567 = vmatpush3.bf16.msra.mxu1 %v610_v11  ;;  %540 = vmatprep.subr.bf16.mxu0 %v611_v12  ;;  %v631_v32 = vld [vmem:[%s800_s0] ss:$16 sps:$4 sm:$0xff]   ;;  %v633_v33 = vld [vmem:[%s800_s0 + $0x4] ss:$16 sps:$4 sm:$0xff]   ;;  %v634_v34 = vld [vmem:[%s800_s0 + $0x8] ss:$16 sps:$4 sm:$0xff]  }
   0xe   :  { %568 = vmatprep.subr.bf16.mxu1 %v612_v13  ;;  %v636_v35 = vld [vmem:[%s800_s0 + $0xc] ss:$16 sps:$4 sm:$0xff]   ;;  %351 = vmatprep.mubr.bf16.mxu0 %v633_v33  ;;  %v637_v36 = vld [vmem:[%s800_s0 + $0x24] ss:$16 sps:$4 sm:$0xff]   ;;  %v641_v38 = vld [vmem:[%s800_s0 + $0x20] ss:$16 sps:$4 sm:$0xff]  }
   0xf   :  { %400 = vmatprep.mubr.bf16.mxu1 %v636_v35  ;;  %v639_v37 = vld [vmem:[%s800_s0 + $0x2c] ss:$16 sps:$4 sm:$0xff]   ;;  %v642_v39 = vld [vmem:[%s800_s0 + $0x28] ss:$16 sps:$4 sm:$0xff]   ;;  %v643_v40 = vld [vmem:[%s801_s2] sm:$0xff]  }
  0x10   :  { %541 = vmatpush3.bf16.msra.mxu0 %v613_v14 }
  0x11   :  { %569 = vmatpush3.bf16.msra.mxu1 %v614_v15  ;;  %542 = vmatprep.subr.bf16.mxu0 %v615_v16 }
  0x12   :  { %570 = vmatprep.subr.bf16.mxu1 %v616_v17 }
  0x14   :  { %543 = vmatpush3.bf16.msra.mxu0 %v617_v18 }
  0x15   :  { %571 = vmatpush3.bf16.msra.mxu1 %v618_v19  ;;  %544 = vmatprep.subr.bf16.mxu0 %v619_v20 }
  0x16   :  { %572 = vmatprep.subr.bf16.mxu1 %v620_v21 }
  0x18   :  { %545 = vmatpush3.bf16.msra.mxu0 %v621_v22 }
  0x19   :  { %573 = vmatpush3.bf16.msra.mxu1 %v622_v23  ;;  %546 = vmatprep.subr.bf16.mxu0 %v623_v24 }
  0x1a   :  { %574 = vmatprep.subr.bf16.mxu1 %v624_v25 }
  0x1c   :  { %547 = vmatpush3.bf16.msra.mxu0 %v625_v26 }
  0x1d   :  { %575 = vmatpush3.bf16.msra.mxu1 %v626_v27  ;;  %548 = vmatprep.subr.bf16.mxu0 %v627_v28 }
  0x1e   :  { %576 = vmatprep.subr.bf16.mxu1 %v628_v29 }
  0x20   :  { %549 = vmatpush3.bf16.msra.mxu0 %v629_v30 }
  0x21   :  { %577 = vmatpush3.bf16.msra.mxu1 %v630_v31  ;;  %593 = vmatprep.subr.bf16.mxu0 %v643_v40 }
  0x23   :  { %352 = vmatmul.mubr.bf16.vlgmr.msra.gmra.mxu0 %v631_v32 }
  0x24   :  { %401 = vmatmul.mubr.bf16.vlgmr.msra.gmra.mxu1 %v634_v34  ;;  %359 = vmatprep.mubr.bf16.mxu0 %v637_v36 }
  0x25   :  { %408 = vmatprep.mubr.bf16.mxu1 %v639_v37  ;;  %594 = vmatpush3.bf16.msra.mxu0 %v643_v40 }
  0x2b   :  { %360 = vmatmul.mubr.bf16.gmra.mxu0 %v641_v38 }
  0x2c   :  { %409 = vmatmul.mubr.bf16.gmra.mxu1 %v642_v39 }
  0xe3   :  { %v550_v41 = vpop.f32.mrf.mxu0 }
  0xe4   :  { %v578_v42 = vpop.f32.mrf.mxu1 }
  0xe5   :  { %v551_v43 = vpop.f32.mrf.mxu0 }
  0xe6   :  { %v579_v44 = vpop.f32.mrf.mxu1  ;;  %v552_v47 = vadd.f32 %v551_v43, %v550_v41 }
  0xe7   :  { %v553_v45 = vpop.f32.mrf.mxu0  ;;  %v580_v48 = vadd.f32 %v579_v44, %v578_v42 }
  0xe8   :  { %v581_v46 = vpop.f32.mrf.mxu1 }
  0xe9   :  { %v554_v49 = vpop.f32.mrf.mxu0  ;;  %v403_v55 = vadd.f32 %v580_v48, %v552_v47 }
  0xea   :  { %v555_v50 = vadd.f32 %v554_v49, %v553_v45  ;;  %v582_v51 = vpop.f32.mrf.mxu1 }
  0xeb   :  { %v583_v52 = vadd.f32 %v582_v51, %v581_v46  ;;  %v556_v53 = vpop.f32.mrf.mxu0 }
  0xec   :  { %v584_v54 = vpop.f32.mrf.mxu1 }
  0xed   :  { %v406_v56 = vadd.f32 %v583_v52, %v555_v50  ;;  %v557_v57 = vpop.f32.mrf.mxu0 }
  0xee   :  { %v585_v58 = vpop.f32.mrf.mxu1  ;;  %v558_v62 = vadd.f32 %v557_v57, %v556_v53 }
  0xef   :  { %v417_v59 = vpack.c.bf16 %v406_v56, %v403_v55  ;;  %v559_v60 = vpop.f32.mrf.mxu0  ;;  %v586_v63 = vadd.f32 %v585_v58, %v584_v54 }
  0xf0   :  { %v587_v61 = vpop.f32.mrf.mxu1 }
  0xf1   :  { %595 = vmatprep.mubr.msk.bf16.mxu0 %vm427_vm0, %v417_v59  ;;  %v560_v0 = vpop.f32.mrf.mxu0  ;;  %v411_v4 = vadd.f32 %v586_v63, %v558_v62 }
  0xf2   :  { %v561_v1 = vadd.f32 %v560_v0, %v559_v60  ;;  %v588_v2 = vpop.f32.mrf.mxu1 }
  0xf3   :  { %v589_v3 = vadd.f32 %v588_v2, %v587_v61 }
  0xf5   :  { %v414_v5 = vadd.f32 %v589_v3, %v561_v1 }
  0xf7   :  { %v418_v6 = vpack.c.bf16 %v414_v5, %v411_v4 }
  0xf9   :  { %596 = vmatmul.mubr.msk.bf16.vlgmr.msra.gmra.mxu0 %vm427_vm0, %v418_v6 }
 0x1b9   :  { %v597_v7 = vpop.f32.mrf.mxu0 }
 0x1ba   :  { %485 = vst [vmem:[%s802_s3 + $0x10] sm:$0xff] %v597_v7 }
 0x1bb   :  { %v468_v8 = vpop.f32.mrf.mxu0 }
 0x1bc   :  { %483 = vst [vmem:[%s802_s3] sm:$0xff] %v468_v8 }
 0x1bd   :  { %v598_v9 = vpop.f32.mrf.mxu0 }
 0x1be   :  { %486 = vst [vmem:[%s802_s3 + $0x18] sm:$0xff] %v598_v9 }
 0x1bf   :  { %v471_v10 = vpop.f32.mrf.mxu0 }
 0x1c0   :  { %484 = vst [vmem:[%s802_s3 + $0x8] sm:$0xff] %v471_v10 }

</bundles_post_ra>
